<compile_context>
chip_gen: v7x
topology: tpu7x:2x2x1
jax: 0.10.0
libtpu: 0.0.40
codegen_flags: <defaults>
</compile_context>

<pallas_src>
import numpy as np
import jax
import jax.numpy as jnp
from jax import lax
from jax.experimental import pallas as pl
from jax.experimental.pallas import tpu as pltpu


# ----------------------------------------------------------------------------
# Pallas kernel: one grid step per batch block.
# ----------------------------------------------------------------------------
def _bilstm_kernel(maxlen_ref,            # SMEM (nblk,) int32   (scalar prefetch)
                   lens_ref,              # VMEM (B_blk, 1) int32
                   x_ref,                 # VMEM (T, B_blk, E) bf16 (time-major)
                   wih_ref,               # VMEM (E, 8H) bf16  [fwd gates | bwd gates]
                   whf_ref,               # VMEM (H, 4H) bf16  fwd hidden weights
                   whb_ref,               # VMEM (H, 4H) bf16  bwd hidden weights
                   b_ref,                 # VMEM (1, 8H) f32   [fwd bias | bwd bias]
                   out_ref,               # VMEM (T, B_blk, 2H) f32
                   qv_ref,                # VMEM (B_blk, 2H) f32
                   gx_s):                 # VMEM (T, B_blk, 8H) f32 scratch
    T, Bb, E = x_ref.shape
    H = whf_ref.shape[0]
    H4 = 4 * H
    L_max = maxlen_ref[pl.program_id(0)]
    lens = lens_ref[...]                                   # (Bb, 1) int32

    # Input projections for every timestep & both directions: one bf16 MXU
    # matmul, f32 accumulation.  Bias is added per-step inside the loop.
    x_flat = x_ref[...].reshape(T * Bb, E)
    gx = jnp.dot(x_flat, wih_ref[...], preferred_element_type=jnp.float32)
    gx_s[...] = gx.reshape(T, Bb, 8 * H)

    # out_ref is only written for t < L_max inside the loop; zero the whole
    # padded block once so t >= L_max (and fully-padded rows) read as zero.
    out_ref[...] = jnp.zeros_like(out_ref)

    # Loop-invariant bias slices (loaded once, broadcast-added per step).
    b_f = b_ref[:, 0:H4]          # (1, 4H) f32
    b_b = b_ref[:, H4:2 * H4]     # (1, 4H) f32

    def lstm_gates(g, c):
        i = jax.nn.sigmoid(g[:, 0:H])
        f = jax.nn.sigmoid(g[:, H:2 * H])
        gg = jnp.tanh(g[:, 2 * H:3 * H])
        o = jax.nn.sigmoid(g[:, 3 * H:4 * H])
        c_new = f * c + i * gg
        h_new = o * jnp.tanh(c_new)
        return h_new, c_new

    # Fused forward + backward recurrence over the dynamic trip count L_max.
    # TODO(synk): on v5e/v6e, stage whf/whb once via pltpu.matmul_push_rhs and
    # drive the MXU with matmul_acc_lhs/matmul_pop per step.
    def step(s, carry):
        hf, cf, hb, cb, acc_f, acc_b = carry
        t_f = s                       # forward time index
        t_b = L_max - 1 - s           # backward time index (last valid token first)

        # Only load the gate half each direction actually uses.
        gx_f = gx_s[t_f, :, 0:H4]            # (Bb, 4H) f32
        gx_b = gx_s[t_b, :, H4:2 * H4]       # (Bb, 4H) f32

        gf = gx_f + b_f + jnp.dot(hf.astype(jnp.bfloat16), whf_ref[...],
                                  preferred_element_type=jnp.float32)
        gb = gx_b + b_b + jnp.dot(hb.astype(jnp.bfloat16), whb_ref[...],
                                  preferred_element_type=jnp.float32)

        hf_new, cf_new = lstm_gates(gf, cf)
        hb_new, cb_new = lstm_gates(gb, cb)

        vf = lens > t_f               # (Bb,1) per-row packed-sequence validity
        vb = lens > t_b
        hf_m = hf_new * vf.astype(jnp.float32)   # padded rows forced to 0
        hb_m = hb_new * vb.astype(jnp.float32)

        # Write hidden states straight into the output block.
        out_ref[t_f, :, 0:H] = hf_m
        out_ref[t_b, :, H:2 * H] = hb_m

        # Running sums for the mean-pool (masked rows contribute 0).
        acc_f = acc_f + hf_m
        acc_b = acc_b + hb_m

        hf = jnp.where(vf, hf_new, hf)
        cf = jnp.where(vf, cf_new, cf)
        # Backward state must stay zero until t reaches L-1 for each row.
        hb = jnp.where(vb, hb_new, hb)
        cb = jnp.where(vb, cb_new, cb)
        return hf, cf, hb, cb, acc_f, acc_b

    zeros = jnp.zeros((Bb, H), jnp.float32)
    carry = (zeros, zeros, zeros, zeros, zeros, zeros)
    _, _, _, _, acc_f, acc_b = lax.fori_loop(0, L_max, step, carry)

    # Mean over valid timesteps == masked sum / L (L=0 rows produce 0).
    inv_len = 1.0 / jnp.maximum(lens, 1).astype(jnp.float32)    # (Bb, 1)
    qv_ref[:, 0:H] = acc_f * inv_len
    qv_ref[:, H:2 * H] = acc_b * inv_len


# ----------------------------------------------------------------------------
# One-time weight re-layout (outside the per-call path). MXU operands -> bf16.
# ----------------------------------------------------------------------------
def prepare_params(params):
    H = params["w_hh_f"].shape[1]
    w_ih_cat = jnp.concatenate(
        [jnp.asarray(params["w_ih_f"]).T, jnp.asarray(params["w_ih_b"]).T],
        axis=1).astype(jnp.bfloat16)                           # (E, 8H)
    b_cat = jnp.concatenate(
        [jnp.asarray(params["b_ih_f"]) + jnp.asarray(params["b_hh_f"]),
         jnp.asarray(params["b_ih_b"]) + jnp.asarray(params["b_hh_b"])]
    ).reshape(1, 8 * H).astype(jnp.float32)
    return {
        "embedding": jnp.asarray(params["embedding"], jnp.float32),
        "w_ih_cat": w_ih_cat,                                              # (E, 8H) bf16
        "w_hh_f_t": jnp.asarray(params["w_hh_f"]).T.astype(jnp.bfloat16),  # (H, 4H) bf16
        "w_hh_b_t": jnp.asarray(params["w_hh_b"]).T.astype(jnp.bfloat16),  # (H, 4H) bf16
        "b_cat": b_cat,                                                    # (1, 8H) f32
    }


def _kernel_vmem_bytes(T, Bb, E, H):
    """Rough per-block VMEM footprint (double-buffered pipeline blocks + scratch)."""
    f32, bf16 = 4, 2
    gx = T * Bb * 8 * H * f32                    # gate-projection scratch
    x_blk = 2 * T * Bb * E * bf16                # input block, double-buffered
    out_blk = 2 * T * Bb * 2 * H * f32           # output block, double-buffered
    qv_blk = 2 * Bb * 2 * H * f32
    lens_blk = 2 * Bb * 4
    # Constant-index weight blocks still get pipeline buffers.
    # (Marking them pipeline_mode=pl.Buffered(1) would halve this.)
    weights = 2 * ((E * 8 * H + 2 * H * 4 * H) * bf16 + 8 * H * f32)
    return gx + x_blk + out_blk + qv_blk + lens_blk + weights


# ----------------------------------------------------------------------------
# Wrapper: length-sort + embedding gather (time-major, bf16) + pallas_call.
# jit-compatible (no host sync); output is padded to the static T, caller may
# slice to max(L) to match pad_packed_sequence(batch_first=True).
# ----------------------------------------------------------------------------
def query_encoder_forward(query_tokens, query_length, prepped, *, block_b=None):
    emb_tbl = prepped["embedding"]
    B, T = query_tokens.shape
    E = emb_tbl.shape[1]
    H = prepped["w_hh_f_t"].shape[0]

    if block_b is None:
        # Aim for >=2 batch blocks so the "parallel" grid axis can shard across
        # both TensorCores on v7x; neutral on v5e/v6e (single TC).
        block_b = max(8, min(128, 8 * pl.cdiv(pl.cdiv(B, 2), 8)))
    B_pad = block_b * pl.cdiv(B, block_b)
    nblk = B_pad // block_b

    lengths = jnp.minimum(query_length.astype(jnp.int32), T)

    # Length-sort rows (descending) so each block's recurrence only runs to a
    # locally tight L_max; outputs are unsorted at the end.  Padded rows
    # (length 0) land in the last block.
    order = jnp.argsort(-lengths)
    inv_order = jnp.argsort(order)
    lengths_s = lengths[order]
    tokens_s = query_tokens[order]

    lens_pad = jnp.zeros((B_pad,), jnp.int32).at[:B].set(lengths_s)
    tokens_pad = jnp.zeros((B_pad, T), tokens_s.dtype).at[:B].set(tokens_s)

    # Embedding gather directly into time-major bf16 activations (no separate
    # transpose pass over the activation tensor).
    # TODO(synk): fuse the gather into the kernel (scalar-prefetched token ids +
    # row-gather DMA) to avoid the HBM round trip of the (T, B_pad, E) block.
    x_tm = jnp.take(emb_tbl, tokens_pad.T, axis=0).astype(jnp.bfloat16)

    maxlen = jnp.max(lens_pad.reshape(nblk, block_b), axis=1).astype(jnp.int32)
    lens_2d = lens_pad.reshape(B_pad, 1)

    grid_spec = pltpu.PrefetchScalarGridSpec(
        num_scalar_prefetch=1,
        grid=(nblk,),
        in_specs=[
            pl.BlockSpec((block_b, 1), lambda b, ml: (b, 0)),
            pl.BlockSpec((T, block_b, E), lambda b, ml: (0, b, 0)),
            pl.BlockSpec((E, 8 * H), lambda b, ml: (0, 0)),
            pl.BlockSpec((H, 4 * H), lambda b, ml: (0, 0)),
            pl.BlockSpec((H, 4 * H), lambda b, ml: (0, 0)),
            pl.BlockSpec((1, 8 * H), lambda b, ml: (0, 0)),
        ],
        out_specs=[
            pl.BlockSpec((T, block_b, 2 * H), lambda b, ml: (0, b, 0)),
            pl.BlockSpec((block_b, 2 * H), lambda b, ml: (b, 0)),
        ],
        scratch_shapes=[
            pltpu.VMEM((T, block_b, 8 * H), jnp.float32),
        ],
    )

    # Explicit VMEM budget: default scoped limits (16 MiB v5e / 32 MiB v6e,v7x)
    # are too small at realistic T/H/Bb.  On v7x (64 MiB physical) pick a
    # smaller block_b if the estimate approaches the cap.
    est = _kernel_vmem_bytes(T, block_b, E, H)
    vmem_limit = max(32 << 20, min(int(est * 1.5) + (2 << 20), 100 << 20))

    out_tm, qv = pl.pallas_call(
        _bilstm_kernel,
        out_shape=(
            jax.ShapeDtypeStruct((T, B_pad, 2 * H), jnp.float32),
            jax.ShapeDtypeStruct((B_pad, 2 * H), jnp.float32),
        ),
        grid_spec=grid_spec,
        compiler_params=pltpu.CompilerParams(
            # Batch-block axis has no cross-step accumulation -> safe to shard
            # across TensorCores (v7x); neutral on v5e/v6e.
            dimension_semantics=("parallel",),
            vmem_limit_bytes=vmem_limit,
        ),
    )(maxlen, lens_2d, x_tm, prepped["w_ih_cat"], prepped["w_hh_f_t"],
      prepped["w_hh_b_t"], prepped["b_cat"])

    # Back to batch-major, original row order (padded rows dropped).
    output = jnp.transpose(out_tm, (1, 0, 2))[inv_order]     # (B, T, 2H)
    q_vector = qv[inv_order]
    return q_vector, output


# ----------------------------------------------------------------------------
# Pure numpy reference (same math as torch.nn.LSTM + packed-sequence handling).
# ----------------------------------------------------------------------------
def _ref_forward(tokens, lengths, params):
    def sigmoid(v):
        return 1.0 / (1.0 + np.exp(-v))

    emb_w = np.asarray(params["embedding"])
    x_all = emb_w[np.asarray(tokens)]  # (B, T, E)
    B, T, E = x_all.shape
    H = params["w_hh_f"].shape[1]

    def run_dir(x, L, w_ih, w_hh, b, reverse):
        h = np.zeros(H, np.float32)
        c = np.zeros(H, np.float32)
        out = np.zeros((T, H), np.float32)
        order = range(L - 1, -1, -1) if reverse else range(L)
        for t in order:
            g = w_ih @ x[t] + w_hh @ h + b
            i = sigmoid(g[0:H]); f = sigmoid(g[H:2 * H])
            gg = np.tanh(g[2 * H:3 * H]); o = sigmoid(g[3 * H:4 * H])
            c = f * c + i * gg
            h = o * np.tanh(c)
            out[t] = h
        return out

    bf = np.asarray(params["b_ih_f"]) + np.asarray(params["b_hh_f"])
    bb = np.asarray(params["b_ih_b"]) + np.asarray(params["b_hh_b"])
    T_out = int(np.max(np.asarray(lengths)))
    out_all = np.zeros((B, T_out, 2 * H), np.float32)
    qv = np.zeros((B, 2 * H), np.float32)
    for bidx in range(B):
        L = int(lengths[bidx])
        of = run_dir(x_all[bidx], L, np.asarray(params["w_ih_f"]),
                     np.asarray(params["w_hh_f"]), bf, reverse=False)
        ob = run_dir(x_all[bidx], L, np.asarray(params["w_ih_b"]),
                     np.asarray(params["w_hh_b"]), bb, reverse=True)
        full = np.concatenate([of, ob], axis=-1)
        out_all[bidx] = full[:T_out]
        qv[bidx] = full[:L].mean(axis=0)
    return qv, out_all


if __name__ == "__main__":
    # Small, forward-consistent sizes: vocab=50, embed_dim=32, hidden_dim=32,
    # batch=2, seq=8 (bidirectional single-layer LSTM).
    vocab_size, embed_dim, hidden_dim = 50, 32, 32
    B, T, H = 2, 8, hidden_dim

    key = jax.random.PRNGKey(0)
    keys = jax.random.split(key, 12)

    def init(k, shape, scale=0.1):
        return scale * jax.random.normal(k, shape, dtype=jnp.float32)

    embedding = init(keys[0], (vocab_size, embed_dim), 0.5)
    embedding = embedding.at[0].set(0.0)  # padding_idx=0

    params = {
        "embedding": embedding,
        "w_ih_f": init(keys[1], (4 * H, embed_dim)),
        "w_hh_f": init(keys[2], (4 * H, H)),
        "b_ih_f": init(keys[3], (4 * H,)),
        "b_hh_f": init(keys[4], (4 * H,)),
        "w_ih_b": init(keys[5], (4 * H, embed_dim)),
        "w_hh_b": init(keys[6], (4 * H, H)),
        "b_ih_b": init(keys[7], (4 * H,)),
        "b_hh_b": init(keys[8], (4 * H,)),
    }

    query_length = jnp.array([8, 5], dtype=jnp.int32)
    query_tokens = jax.random.randint(keys[9], (B, T), 1, vocab_size, dtype=jnp.int32)
    # zero out padding positions (token id 0 == padding_idx)
    tmask = (jnp.arange(T)[None, :] < query_length[:, None]).astype(jnp.int32)
    query_tokens = query_tokens * tmask

    prepped = prepare_params(params)
    fwd = jax.jit(query_encoder_forward)
    q_vector, out_pad = fwd(query_tokens, query_length, prepped)
    q_vector = jax.block_until_ready(q_vector)
    out_pad = jax.block_until_ready(out_pad)

    # pad_packed_sequence(batch_first=True) pads only to max(query_length):
    # slice outside the jitted path (no host sync inside the kernel wrapper).
    T_out = int(np.max(np.asarray(query_length)))
    output = np.asarray(out_pad)[:, :T_out, :]

    qv_ref, out_ref = _ref_forward(np.asarray(query_tokens),
                                   np.asarray(query_length), params)
    # bf16 MXU operands -> looser tolerance than the f32 version.
    np.testing.assert_allclose(np.asarray(q_vector), qv_ref, rtol=2e-2, atol=2e-2)
    np.testing.assert_allclose(output, out_ref, rtol=2e-2, atol=2e-2)

    print("KERNEL_OK")
</pallas_src>

<mosaic_0001>
module attributes {stable_mosaic.version = 11 : i64} {
  func.func @_bilstm_kernel(%arg0: i32, %arg1: memref<1xi32, #tpu.memory_space<smem>>, %arg2: memref<8x1xi32, #tpu.memory_space<vmem>>, %arg3: memref<8x8x32xbf16, #tpu.memory_space<vmem>>, %arg4: memref<32x256xbf16, #tpu.memory_space<vmem>>, %arg5: memref<32x128xbf16, #tpu.memory_space<vmem>>, %arg6: memref<32x128xbf16, #tpu.memory_space<vmem>>, %arg7: memref<1x256xf32, #tpu.memory_space<vmem>>, %arg8: memref<8x8x64xf32, #tpu.memory_space<vmem>>, %arg9: memref<8x64xf32, #tpu.memory_space<vmem>>, %arg10: memref<8x8x256xf32, #tpu.memory_space<vmem>>) attributes {dimension_semantics = [#tpu.dimension_semantics<parallel>], iteration_bounds = array<i64: 1>, scalar_prefetch = 1 : i64, scratch_operands = 1 : i64, tpu.core_type = #tpu.core_type<tc>, window_params = [{transform_indices = @transform_0, window_bounds = array<i64: 8, 1>}, {transform_indices = @transform_1, window_bounds = array<i64: 8, 8, 32>}, {pipeline_mode = #tpu.pipeline_mode<synchronous>, transform_indices = @transform_2, window_bounds = array<i64: 32, 256>}, {pipeline_mode = #tpu.pipeline_mode<synchronous>, transform_indices = @transform_3, window_bounds = array<i64: 32, 128>}, {pipeline_mode = #tpu.pipeline_mode<synchronous>, transform_indices = @transform_4, window_bounds = array<i64: 32, 128>}, {pipeline_mode = #tpu.pipeline_mode<synchronous>, transform_indices = @transform_5, window_bounds = array<i64: 1, 256>}, {transform_indices = @transform_6, window_bounds = array<i64: 8, 8, 64>}, {transform_indices = @transform_7, window_bounds = array<i64: 8, 64>}]} {
    %0 = arith.index_cast %arg0 : i32 to index
    %1 = memref.load %arg1[%0] : memref<1xi32, #tpu.memory_space<smem>>
    %c0 = arith.constant 0 : index
    %c0_0 = arith.constant 0 : index
    %2 = vector.load %arg2[%c0, %c0_0] : memref<8x1xi32, #tpu.memory_space<vmem>>, vector<8x1xi32>
    %c0_1 = arith.constant 0 : index
    %c0_2 = arith.constant 0 : index
    %c0_3 = arith.constant 0 : index
    %3 = vector.load %arg3[%c0_1, %c0_2, %c0_3] : memref<8x8x32xbf16, #tpu.memory_space<vmem>>, vector<8x8x32xbf16>
    %4 = vector.shape_cast %3 : vector<8x8x32xbf16> to vector<64x32xbf16>
    %c0_4 = arith.constant 0 : index
    %c0_5 = arith.constant 0 : index
    %5 = vector.load %arg4[%c0_4, %c0_5] : memref<32x256xbf16, #tpu.memory_space<vmem>>, vector<32x256xbf16>
    %cst = arith.constant dense<0.000000e+00> : vector<64x256xf32>
    %6 = tpu.matmul %4, %5, %cst {dimension_numbers = #tpu.dot_dimension_numbers<[1], [0], [0], [1], [0, 0, 1, 1], [], []>} : vector<64x32xbf16>, vector<32x256xbf16>, vector<64x256xf32> -> vector<64x256xf32>
    %7 = vector.shape_cast %6 : vector<64x256xf32> to vector<8x8x256xf32>
    %c0_6 = arith.constant 0 : index
    %c0_7 = arith.constant 0 : index
    %c0_8 = arith.constant 0 : index
    %8 = vector.load %arg10[%c0_6, %c0_7, %c0_8] : memref<8x8x256xf32, #tpu.memory_space<vmem>>, vector<8x8x256xf32>
    tpu.vector_store %arg10[%c0_6, %c0_7, %c0_8], %7 {strides = array<i32>} : memref<8x8x256xf32, #tpu.memory_space<vmem>>, vector<8x8x256xf32>,
    %cst_9 = arith.constant 0.000000e+00 : f32
    %9 = vector.broadcast %cst_9 : f32 to vector<8x8x64xf32>
    %c0_10 = arith.constant 0 : index
    %c0_11 = arith.constant 0 : index
    %c0_12 = arith.constant 0 : index
    %10 = vector.load %arg8[%c0_10, %c0_11, %c0_12] : memref<8x8x64xf32, #tpu.memory_space<vmem>>, vector<8x8x64xf32>
    tpu.vector_store %arg8[%c0_10, %c0_11, %c0_12], %9 {strides = array<i32>} : memref<8x8x64xf32, #tpu.memory_space<vmem>>, vector<8x8x64xf32>,
    %c0_13 = arith.constant 0 : index
    %c0_14 = arith.constant 0 : index
    %11 = vector.load %arg7[%c0_13, %c0_14] : memref<1x256xf32, #tpu.memory_space<vmem>>, vector<1x128xf32>
    %c0_15 = arith.constant 0 : index
    %c128 = arith.constant 128 : index
    %12 = vector.load %arg7[%c0_15, %c128] : memref<1x256xf32, #tpu.memory_space<vmem>>, vector<1x128xf32>
    %cst_16 = arith.constant 0.000000e+00 : f32
    %13 = vector.broadcast %cst_16 : f32 to vector<8x32xf32>
    %c0_i32 = arith.constant 0 : i32
    %14 = arith.subi %1, %c0_i32 : i32
    %15 = arith.addi %c0_i32, %14 : i32
    %c1_i32 = arith.constant 1 : i32
    %16:6 = scf.for %arg11 = %c0_i32 to %15 step %c1_i32 iter_args(%arg12 = %13, %arg13 = %13, %arg14 = %13, %arg15 = %13, %arg16 = %13, %arg17 = %13) -> (vector<8x32xf32>, vector<8x32xf32>, vector<8x32xf32>, vector<8x32xf32>, vector<8x32xf32>, vector<8x32xf32>)  : i32 {
      %c1_i32_22 = arith.constant 1 : i32
      %28 = arith.subi %1, %c1_i32_22 : i32
      %29 = arith.subi %28, %arg11 : i32
      %30 = arith.index_cast %arg11 : i32 to index
      %c0_23 = arith.constant 0 : index
      %c0_24 = arith.constant 0 : index
      %31 = vector.load %arg10[%30, %c0_23, %c0_24] : memref<8x8x256xf32, #tpu.memory_space<vmem>>, vector<1x8x128xf32>
      %32 = vector.shape_cast %31 : vector<1x8x128xf32> to vector<8x128xf32>
      %33 = arith.index_cast %29 : i32 to index
      %c0_25 = arith.constant 0 : index
      %c128_26 = arith.constant 128 : index
      %34 = vector.load %arg10[%33, %c0_25, %c128_26] : memref<8x8x256xf32, #tpu.memory_space<vmem>>, vector<1x8x128xf32>
      %35 = vector.shape_cast %34 : vector<1x8x128xf32> to vector<8x128xf32>
      %36 = vector.broadcast %11 : vector<1x128xf32> to vector<8x128xf32>
      %37 = arith.addf %32, %36 : vector<8x128xf32>
      %38 = arith.truncf %arg12 : vector<8x32xf32> to vector<8x32xbf16>
      %c0_27 = arith.constant 0 : index
      %c0_28 = arith.constant 0 : index
      %39 = vector.load %arg5[%c0_27, %c0_28] : memref<32x128xbf16, #tpu.memory_space<vmem>>, vector<32x128xbf16>
      %cst_29 = arith.constant dense<0.000000e+00> : vector<8x128xf32>
      %40 = tpu.matmul %38, %39, %cst_29 {dimension_numbers = #tpu.dot_dimension_numbers<[1], [0], [0], [1], [0, 0, 1, 1], [], []>} : vector<8x32xbf16>, vector<32x128xbf16>, vector<8x128xf32> -> vector<8x128xf32>
      %41 = arith.addf %37, %40 : vector<8x128xf32>
      %42 = vector.broadcast %12 : vector<1x128xf32> to vector<8x128xf32>
      %43 = arith.addf %35, %42 : vector<8x128xf32>
      %44 = arith.truncf %arg14 : vector<8x32xf32> to vector<8x32xbf16>
      %c0_30 = arith.constant 0 : index
      %c0_31 = arith.constant 0 : index
      %45 = vector.load %arg6[%c0_30, %c0_31] : memref<32x128xbf16, #tpu.memory_space<vmem>>, vector<32x128xbf16>
      %cst_32 = arith.constant dense<0.000000e+00> : vector<8x128xf32>
      %46 = tpu.matmul %44, %45, %cst_32 {dimension_numbers = #tpu.dot_dimension_numbers<[1], [0], [0], [1], [0, 0, 1, 1], [], []>} : vector<8x32xbf16>, vector<32x128xbf16>, vector<8x128xf32> -> vector<8x128xf32>
      %47 = arith.addf %43, %46 : vector<8x128xf32>
      %48 = vector.extract_strided_slice %41 {offsets = [0, 0], sizes = [8, 32], strides = [1, 1]} : vector<8x128xf32> to vector<8x32xf32>
      %49 = arith.negf %48 : vector<8x32xf32>
      %50 = math.exp %49 : vector<8x32xf32>
      %cst_33 = arith.constant 1.000000e+00 : f32
      %51 = vector.broadcast %cst_33 : f32 to vector<8x32xf32>
      %52 = arith.addf %51, %50 : vector<8x32xf32>
      %53 = arith.divf %51, %52 : vector<8x32xf32>
      %54 = vector.extract_strided_slice %41 {offsets = [0, 32], sizes = [8, 32], strides = [1, 1]} : vector<8x128xf32> to vector<8x32xf32>
      %55 = arith.negf %54 : vector<8x32xf32>
      %56 = math.exp %55 : vector<8x32xf32>
      %cst_34 = arith.constant 1.000000e+00 : f32
      %57 = vector.broadcast %cst_34 : f32 to vector<8x32xf32>
      %58 = arith.addf %57, %56 : vector<8x32xf32>
      %59 = arith.divf %57, %58 : vector<8x32xf32>
      %60 = vector.extract_strided_slice %41 {offsets = [0, 64], sizes = [8, 32], strides = [1, 1]} : vector<8x128xf32> to vector<8x32xf32>
      %61 = math.tanh %60 : vector<8x32xf32>
      %62 = vector.extract_strided_slice %41 {offsets = [0, 96], sizes = [8, 32], strides = [1, 1]} : vector<8x128xf32> to vector<8x32xf32>
      %63 = arith.negf %62 : vector<8x32xf32>
      %64 = math.exp %63 : vector<8x32xf32>
      %cst_35 = arith.constant 1.000000e+00 : f32
      %65 = vector.broadcast %cst_35 : f32 to vector<8x32xf32>
      %66 = arith.addf %65, %64 : vector<8x32xf32>
      %67 = arith.divf %65, %66 : vector<8x32xf32>
      %68 = arith.mulf %59, %arg13 : vector<8x32xf32>
      %69 = arith.mulf %53, %61 : vector<8x32xf32>
      %70 = arith.addf %68, %69 : vector<8x32xf32>
      %71 = math.tanh %70 : vector<8x32xf32>
      %72 = arith.mulf %67, %71 : vector<8x32xf32>
      %73 = vector.extract_strided_slice %47 {offsets = [0, 0], sizes = [8, 32], strides = [1, 1]} : vector<8x128xf32> to vector<8x32xf32>
      %74 = arith.negf %73 : vector<8x32xf32>
      %75 = math.exp %74 : vector<8x32xf32>
      %cst_36 = arith.constant 1.000000e+00 : f32
      %76 = vector.broadcast %cst_36 : f32 to vector<8x32xf32>
      %77 = arith.addf %76, %75 : vector<8x32xf32>
      %78 = arith.divf %76, %77 : vector<8x32xf32>
      %79 = vector.extract_strided_slice %47 {offsets = [0, 32], sizes = [8, 32], strides = [1, 1]} : vector<8x128xf32> to vector<8x32xf32>
      %80 = arith.negf %79 : vector<8x32xf32>
      %81 = math.exp %80 : vector<8x32xf32>
      %cst_37 = arith.constant 1.000000e+00 : f32
      %82 = vector.broadcast %cst_37 : f32 to vector<8x32xf32>
      %83 = arith.addf %82, %81 : vector<8x32xf32>
      %84 = arith.divf %82, %83 : vector<8x32xf32>
      %85 = vector.extract_strided_slice %47 {offsets = [0, 64], sizes = [8, 32], strides = [1, 1]} : vector<8x128xf32> to vector<8x32xf32>
      %86 = math.tanh %85 : vector<8x32xf32>
      %87 = vector.extract_strided_slice %47 {offsets = [0, 96], sizes = [8, 32], strides = [1, 1]} : vector<8x128xf32> to vector<8x32xf32>
      %88 = arith.negf %87 : vector<8x32xf32>
      %89 = math.exp %88 : vector<8x32xf32>
      %cst_38 = arith.constant 1.000000e+00 : f32
      %90 = vector.broadcast %cst_38 : f32 to vector<8x32xf32>
      %91 = arith.addf %90, %89 : vector<8x32xf32>
      %92 = arith.divf %90, %91 : vector<8x32xf32>
      %93 = arith.mulf %84, %arg15 : vector<8x32xf32>
      %94 = arith.mulf %78, %86 : vector<8x32xf32>
      %95 = arith.addf %93, %94 : vector<8x32xf32>
      %96 = math.tanh %95 : vector<8x32xf32>
      %97 = arith.mulf %92, %96 : vector<8x32xf32>
      %98 = vector.broadcast %arg11 : i32 to vector<8x1xi32>
      %99 = arith.cmpi sgt, %2, %98 : vector<8x1xi32>
      %100 = vector.broadcast %29 : i32 to vector<8x1xi32>
      %101 = arith.cmpi sgt, %2, %100 : vector<8x1xi32>
      %102 = arith.extui %99 : vector<8x1xi1> to vector<8x1xi32>
      %103 = arith.sitofp %102 : vector<8x1xi32> to vector<8x1xf32>
      %104 = vector.broadcast %103 : vector<8x1xf32> to vector<8x32xf32>
      %105 = arith.mulf %72, %104 : vector<8x32xf32>
      %106 = arith.extui %101 : vector<8x1xi1> to vector<8x1xi32>
      %107 = arith.sitofp %106 : vector<8x1xi32> to vector<8x1xf32>
      %108 = vector.broadcast %107 : vector<8x1xf32> to vector<8x32xf32>
      %109 = arith.mulf %97, %108 : vector<8x32xf32>
      %110 = arith.index_cast %arg11 : i32 to index
      %c0_39 = arith.constant 0 : index
      %c0_40 = arith.constant 0 : index
      %111 = vector.load %arg8[%110, %c0_39, %c0_40] : memref<8x8x64xf32, #tpu.memory_space<vmem>>, vector<1x8x32xf32>
      %112 = vector.shape_cast %111 : vector<1x8x32xf32> to vector<8x32xf32>
      %113 = vector.shape_cast %105 : vector<8x32xf32> to vector<1x8x32xf32>
      tpu.vector_store %arg8[%110, %c0_39, %c0_40], %113 {strides = array<i32>} : memref<8x8x64xf32, #tpu.memory_space<vmem>>, vector<1x8x32xf32>,
      %114 = arith.index_cast %29 : i32 to index
      %c0_41 = arith.constant 0 : index
      %c32_42 = arith.constant 32 : index
      %115 = vector.load %arg8[%114, %c0_41, %c32_42] : memref<8x8x64xf32, #tpu.memory_space<vmem>>, vector<1x8x32xf32>
      %116 = vector.shape_cast %115 : vector<1x8x32xf32> to vector<8x32xf32>
      %117 = vector.shape_cast %109 : vector<8x32xf32> to vector<1x8x32xf32>
      tpu.vector_store %arg8[%114, %c0_41, %c32_42], %117 {strides = array<i32>} : memref<8x8x64xf32, #tpu.memory_space<vmem>>, vector<1x8x32xf32>,
      %118 = arith.addf %arg16, %105 : vector<8x32xf32>
      %119 = arith.addf %arg17, %109 : vector<8x32xf32>
      %120 = vector.shape_cast %99 : vector<8x1xi1> to vector<8x1xi1>
      %121 = vector.broadcast %120 : vector<8x1xi1> to vector<8x32xi1>
      %122 = arith.select %121, %72, %arg12 : vector<8x32xi1>, vector<8x32xf32>
      %123 = vector.shape_cast %99 : vector<8x1xi1> to vector<8x1xi1>
      %124 = vector.broadcast %123 : vector<8x1xi1> to vector<8x32xi1>
      %125 = arith.select %124, %70, %arg13 : vector<8x32xi1>, vector<8x32xf32>
      %126 = vector.shape_cast %101 : vector<8x1xi1> to vector<8x1xi1>
      %127 = vector.broadcast %126 : vector<8x1xi1> to vector<8x32xi1>
      %128 = arith.select %127, %97, %arg14 : vector<8x32xi1>, vector<8x32xf32>
      %129 = vector.shape_cast %101 : vector<8x1xi1> to vector<8x1xi1>
      %130 = vector.broadcast %129 : vector<8x1xi1> to vector<8x32xi1>
      %131 = arith.select %130, %95, %arg15 : vector<8x32xi1>, vector<8x32xf32>
      scf.yield %122, %125, %128, %131, %118, %119 : vector<8x32xf32>, vector<8x32xf32>, vector<8x32xf32>, vector<8x32xf32>, vector<8x32xf32>, vector<8x32xf32>
    }
    %c1_i32_17 = arith.constant 1 : i32
    %17 = vector.broadcast %c1_i32_17 : i32 to vector<8x1xi32>
    %18 = arith.maxsi %2, %17 : vector<8x1xi32>
    %19 = arith.sitofp %18 : vector<8x1xi32> to vector<8x1xf32>
    %cst_18 = arith.constant 1.000000e+00 : f32
    %20 = vector.broadcast %cst_18 : f32 to vector<8x1xf32>
    %21 = arith.divf %20, %19 : vector<8x1xf32>
    %22 = vector.broadcast %21 : vector<8x1xf32> to vector<8x32xf32>
    %23 = arith.mulf %16#4, %22 : vector<8x32xf32>
    %c0_19 = arith.constant 0 : index
    %c0_20 = arith.constant 0 : index
    %24 = vector.load %arg9[%c0_19, %c0_20] : memref<8x64xf32, #tpu.memory_space<vmem>>, vector<8x32xf32>
    tpu.vector_store %arg9[%c0_19, %c0_20], %23 {strides = array<i32>} : memref<8x64xf32, #tpu.memory_space<vmem>>, vector<8x32xf32>,
    %25 = vector.broadcast %21 : vector<8x1xf32> to vector<8x32xf32>
    %26 = arith.mulf %16#5, %25 : vector<8x32xf32>
    %c0_21 = arith.constant 0 : index
    %c32 = arith.constant 32 : index
    %27 = vector.load %arg9[%c0_21, %c32] : memref<8x64xf32, #tpu.memory_space<vmem>>, vector<8x32xf32>
    tpu.vector_store %arg9[%c0_21, %c32], %26 {strides = array<i32>} : memref<8x64xf32, #tpu.memory_space<vmem>>, vector<8x32xf32>,
    return
  }
  func.func @transform_0(%arg0: i32, %arg1: memref<1xi32, #tpu.memory_space<smem>>) -> (i32, i32) {
    %c0_i32 = arith.constant 0 : i32
    %c0_i32_0 = arith.constant 0 : i32
    return %arg0, %c0_i32 : i32, i32
  }
  func.func @transform_1(%arg0: i32, %arg1: memref<1xi32, #tpu.memory_space<smem>>) -> (i32, i32, i32) {
    %c0_i32 = arith.constant 0 : i32
    %c0_i32_0 = arith.constant 0 : i32
    %c0_i32_1 = arith.constant 0 : i32
    return %c0_i32, %arg0, %c0_i32_0 : i32, i32, i32
  }
  func.func @transform_2(%arg0: i32, %arg1: memref<1xi32, #tpu.memory_space<smem>>) -> (i32, i32) {
    %c0_i32 = arith.constant 0 : i32
    %c0_i32_0 = arith.constant 0 : i32
    %c0_i32_1 = arith.constant 0 : i32
    return %c0_i32, %c0_i32_0 : i32, i32
  }
  func.func @transform_3(%arg0: i32, %arg1: memref<1xi32, #tpu.memory_space<smem>>) -> (i32, i32) {
    %c0_i32 = arith.constant 0 : i32
    %c0_i32_0 = arith.constant 0 : i32
    %c0_i32_1 = arith.constant 0 : i32
    return %c0_i32, %c0_i32_0 : i32, i32
  }
  func.func @transform_4(%arg0: i32, %arg1: memref<1xi32, #tpu.memory_space<smem>>) -> (i32, i32) {
    %c0_i32 = arith.constant 0 : i32
    %c0_i32_0 = arith.constant 0 : i32
    %c0_i32_1 = arith.constant 0 : i32
    return %c0_i32, %c0_i32_0 : i32, i32
  }
  func.func @transform_5(%arg0: i32, %arg1: memref<1xi32, #tpu.memory_space<smem>>) -> (i32, i32) {
    %c0_i32 = arith.constant 0 : i32
    %c0_i32_0 = arith.constant 0 : i32
    %c0_i32_1 = arith.constant 0 : i32
    return %c0_i32, %c0_i32_0 : i32, i32
  }
  func.func @transform_6(%arg0: i32, %arg1: memref<1xi32, #tpu.memory_space<smem>>) -> (i32, i32, i32) {
    %c0_i32 = arith.constant 0 : i32
    %c0_i32_0 = arith.constant 0 : i32
    %c0_i32_1 = arith.constant 0 : i32
    return %c0_i32, %arg0, %c0_i32_0 : i32, i32, i32
  }
  func.func @transform_7(%arg0: i32, %arg1: memref<1xi32, #tpu.memory_space<smem>>) -> (i32, i32) {
    %c0_i32 = arith.constant 0 : i32
    %c0_i32_0 = arith.constant 0 : i32
    return %arg0, %c0_i32 : i32, i32
  }
}

</mosaic_0001>

<bundles_post_ra>
// kernel: query_encoder_forward.1
= control target key start
LH: loop header
LB: loop body
LE: loop exit
PB: predicated region body
PF: predicated region fallthrough
CT: control target
= control target key end

     0   :  { %v771_v1 = vmov 0   ;;  %vm82_vm0 = vcmask 261120   ;;  %vm184_vm1 = vcmask 523264   ;;  %v772_v10 = vmov 0.0   ;;  %s1047_s0 = inlined_call_operand.<no memory space> [shape: s32[1], index: 0, kind: input, shape index: {}]   ;;  %s1048_s1 = inlined_call_operand.vmem [shape: s32[8,1], index: 1, kind: input, shape index: {}]   ;;  %s1049_s3 = inlined_call_operand.vmem [shape: bf16[32,256], index: 3, kind: input, shape index: {}]   ;;  %s1050_s4 = inlined_call_operand.vmem [shape: bf16[32,128], index: 4, kind: input, shape index: {}]   ;;  %s1051_s5 = inlined_call_operand.vmem [shape: bf16[32,128], index: 5, kind: input, shape index: {}]   ;;  %s1052_s8 = inlined_call_operand.vmem [shape: f32[8,64], index: 8, kind: output, shape index: {1}]   ;;  %s1053_s2 = inlined_call_operand.vmem [shape: bf16[8,8,32], index: 2, kind: input, shape index: {}]   ;;  %s1054_s6 = inlined_call_operand.vmem [shape: f32[1,256], index: 6, kind: input, shape index: {}]   ;;  %s1055_s7 = inlined_call_operand.vmem [shape: f32[8,8,64], index: 7, kind: output, shape index: {0}]  }
   0x1   :  { %v828_v0 = vld [vmem:[%s1048_s1] sm:$0xff]  ;;  %127 = vmatprep.mubr.bf16.mxu0 %v771_v1  ;;  %147 = vmatprep.mubr.bf16.mxu1 %v771_v1  ;;  %v662_v4 = vld [vmem:[%s1049_s3 + $0x14] ss:$8 sps:$4 sm:$0xff]   ;;  %v664_v5 = vld [vmem:[%s1049_s3 + $0x10] ss:$8 sps:$4 sm:$0xff]   ;;  %185 = vst.msk [vmem:[%s1055_s7] sm:$0xff] %vm184_vm1, %v772_v10 }
   0x2   :  { %v659_v2 = vld [vmem:[%s1049_s3 + $0x4] ss:$8 sps:$4 sm:$0xff]   ;;  %v661_v3 = vld [vmem:[%s1049_s3] ss:$8 sps:$4 sm:$0xff]   ;;  %v666_v7 = vld [vmem:[%s1053_s2 + $0x10] sm:$0xff]   ;;  %186 = vst.msk [vmem:[%s1055_s7 + $0x8] sm:$0xff] %vm184_vm1, %v772_v10 }
   0x3   :  { %95 = vmatprep.subr.bf16.mxu0 %v659_v2  ;;  %574 = vmatprep.subr.bf16.mxu1 %v659_v2  ;;  %v665_v6 = vld [vmem:[%s1053_s2] sm:$0xff]   ;;  %v667_v8 = vld [vmem:[%s1053_s2 + $0x8] sm:$0xff]   ;;  %v668_v9 = vld [vmem:[%s1053_s2 + $0x18] sm:$0xff]   ;;  %187 = vst.msk [vmem:[%s1055_s7 + $0x10] sm:$0xff] %vm184_vm1, %v772_v10  ;;  %p530_p0 = scmp.le.s32.totalorder %s1047_s0, 0  ;;  %v899_v29 = vmov 0.0  }
   0x4   :  { %96 = vmatpush1.bf16.msra.mxu0 %v661_v3  ;;  %576 = vmatpush1.bf16.msra.mxu1 %v661_v3  ;;  %188 = vst.msk [vmem:[%s1055_s7 + $0x18] sm:$0xff] %vm184_vm1, %v772_v10  ;;  %189 = vst.msk [vmem:[%s1055_s7 + $0x20] sm:$0xff] %vm184_vm1, %v772_v10  ;;  %v889_v11 = vld [vmem:[%s1054_s6] ss:$0 sm:$0xff]  ;;  %v894_v12 = vld [vmem:[%s1054_s6 + $0x1] ss:$0 sm:$0xff] }
   0x5   :  { %97 = vmatprep.subr.bf16.mxu0 %v662_v4  ;;  %575 = vmatprep.subr.bf16.mxu1 %v662_v4  ;;  %190 = vst.msk [vmem:[%s1055_s7 + $0x28] sm:$0xff] %vm184_vm1, %v772_v10  ;;  %191 = vst.msk [vmem:[%s1055_s7 + $0x30] sm:$0xff] %vm184_vm1, %v772_v10  ;;  %v901_v30 = vmov 0.0   ;;  %v903_v31 = vmov (!%p530_p0), 0.0   ;;  %v905_v32 = vmov (!%p530_p0), 0.0   ;;  %v907_v33 = vmov (!%p530_p0), 0.0  }
   0x6   :  { %192 = vst.msk [vmem:[%s1055_s7 + $0x38] sm:$0xff] %vm184_vm1, %v772_v10  ;;  %v909_v34 = vmov (!%p530_p0), 0.0   ;;  %v911_v35 = vmov (!%p530_p0), 0.0   ;;  %v913_v36 = vmov (!%p530_p0), 0.0   ;;  %s915_s3 = smov (!%p530_p0), 0  }
   0x8   :  { %98 = vmatpush1.bf16.msra.mxu0 %v664_v5  ;;  %577 = vmatpush1.bf16.msra.mxu1 %v664_v5 }
   0xb   :  { %526 = vmatmul.mubr.msk.bf16.vlgmr.msra.gmra.mrb[0].mxu0 %vm82_vm0, %v665_v6  ;;  %528 = vmatmul.mubr.msk.bf16.vlgmr.msra.gmra.mrb[0].mxu1 %vm82_vm0, %v666_v7 }
   0xc   :  { %137 = vmatprep.mubr.bf16.mxu0 %v771_v1  ;;  %157 = vmatprep.mubr.bf16.mxu1 %v771_v1 }
  0x13   :  { %527 = vmatmul.mubr.msk.bf16.gmra.mrb[4].mxu0 %vm82_vm0, %v667_v8  ;;  %529 = vmatmul.mubr.msk.bf16.gmra.mrb[4].mxu1 %vm82_vm0, %v668_v9 }
  0xde   :  { %v129_v13 = vpop.f32.mrb[0].mxu0  ;;  %v149_v14 = vpop.f32.mrb[0].mxu1 }
  0xdf   :  { %168 = vst [vmem:[#allocation2] sm:$0xff] %v129_v13  ;;  %176 = vst [vmem:[#allocation2 + $0x40] sm:$0xff] %v149_v14  ;;  %v131_v15 = vpop.f32.mrb[1].mxu0  ;;  %v151_v16 = vpop.f32.mrb[1].mxu1 }
  0xe0   :  { %169 = vst [vmem:[#allocation2 + $0x8] sm:$0xff] %v131_v15  ;;  %177 = vst [vmem:[#allocation2 + $0x48] sm:$0xff] %v151_v16  ;;  %v133_v17 = vpop.f32.mrb[2].mxu0  ;;  %v153_v18 = vpop.f32.mrb[2].mxu1 }
  0xe1   :  { %170 = vst [vmem:[#allocation2 + $0x10] sm:$0xff] %v133_v17  ;;  %178 = vst [vmem:[#allocation2 + $0x50] sm:$0xff] %v153_v18  ;;  %v135_v19 = vpop.f32.mrb[3].mxu0  ;;  %v155_v20 = vpop.f32.mrb[3].mxu1 }
  0xe2   :  { %171 = vst [vmem:[#allocation2 + $0x18] sm:$0xff] %v135_v19  ;;  %179 = vst [vmem:[#allocation2 + $0x58] sm:$0xff] %v155_v20 }
  0xe4   :  { %503 = sbr.rel (%p530_p0) target bundleno = 1062 (0x426), region = 57 }
  0xe6   :  { %v139_v21 = vpop.f32.mrb[4].mxu0  ;;  %v159_v22 = vpop.f32.mrb[4].mxu1 }
  0xe7   :  { %172 = vst [vmem:[#allocation2 + $0x20] sm:$0xff] %v139_v21  ;;  %180 = vst [vmem:[#allocation2 + $0x60] sm:$0xff] %v159_v22  ;;  %v141_v23 = vpop.f32.mrb[5].mxu0  ;;  %v161_v24 = vpop.f32.mrb[5].mxu1 }
  0xe8   :  { %173 = vst [vmem:[#allocation2 + $0x28] sm:$0xff] %v141_v23  ;;  %181 = vst [vmem:[#allocation2 + $0x68] sm:$0xff] %v161_v24  ;;  %v143_v25 = vpop.f32.mrb[6].mxu0  ;;  %v163_v26 = vpop.f32.mrb[6].mxu1 }
  0xe9   :  { %174 = vst [vmem:[#allocation2 + $0x30] sm:$0xff] %v143_v25  ;;  %182 = vst [vmem:[#allocation2 + $0x70] sm:$0xff] %v163_v26  ;;  %v145_v27 = vpop.f32.mrb[7].mxu0  ;;  %v165_v28 = vpop.f32.mrb[7].mxu1 }
  0xea   :  { %175 = vst [vmem:[#allocation2 + $0x38] sm:$0xff] %v145_v27  ;;  %183 = vst [vmem:[#allocation2 + $0x78] sm:$0xff] %v165_v28 }
  0xeb LB: > { %v773_v37 = vmov 0.0   ;;  %v676_v38 = vld [vmem:[%s1050_s4] sm:$0xff]   ;;  %v224_v39 = vpack.c.bf16 %v757_v36, %v757_v36  ;;  %v677_v40 = vld [vmem:[%s1050_s4 + $0x8] sm:$0xff]   ;;  %vm774_vm2 = vmmov 0   ;;  %s775_s24 = smov 32   ;;  %v295_v42 = vpack.c.bf16 %v749_v34, %v749_v34  ;;  %s531_s28 = sadd.s32 4294967295, %s1047_s0  ;;  %s761_s3 = sphi %s915_s3, %s198_s3   ;;  %v757_v36 = vphi %v913_v36, %v448_v36   ;;  %v753_v35 = vphi %v911_v35, %v449_v35   ;;  %v749_v34 = vphi %v909_v34, %v454_v34   ;;  %v745_v33 = vphi %v907_v33, %v455_v33   ;;  %v741_v32 = vphi %v905_v32, %v1059_v32   ;;  %v737_v31 = vphi %v903_v31, %v1058_v31  }
  0xec   : > { %558 = vmatprep.subr.bf16.mxu0 %v773_v37  ;;  %566 = vmatprep.subr.bf16.mxu1 %v773_v37  ;;  %v678_v41 = vld [vmem:[%s1051_s5] sm:$0xff]   ;;  %v679_v43 = vld [vmem:[%s1051_s5 + $0x8] sm:$0xff]   ;;  %s550_s29 = sshll.u32 %s761_s3, 4  ;;  %s969_s30 = ssub.s32 %s531_s28, %s761_s3  ;;  %v776_v59 = vmov 0   ;;  %v407_v7 = vstv %s761_s3  ;;  %vm440_vm7 = vcmask 523520  }
  0xed   : > { %562 = vmatprep.mubr.msk.bf16.mxu0 %vm774_vm2, %v773_v37  ;;  %570 = vmatprep.mubr.msk.bf16.mxu1 %vm774_vm2, %v773_v37  ;;  %s551_s9 = sshll.u32 %s969_s30, 4  ;;  %s211_s10 = scalar_lea.vmem [#allocation2], %s550_s29  ;;  %v409_v8 = vstv %s969_s30  ;;  %vm408_vm3 = vcmp.gt.s32.totalorder %v828_v0, %v407_v7 }
  0xee   : > { %559 = vmatpush3.bf16.msra.mxu0 %v676_v38  ;;  %230 = vrot.lane.b32.xlu0 %v224_v39, %s775_s24  ;;  %s215_s11 = scalar_lea.vmem [#allocation2], %s551_s9  ;;  %s777_s12 = smov 64   ;;  %vm980_vm4 = vcmp.gt.s32.totalorder %v828_v0, %v409_v8  ;;  %v546_v14 = vsel %vm408_vm3, 1.0, %v773_v37  ;;  %v411_v21 = vsel %vm408_vm3, 1, %v776_v59 }
  0xef   : > { %560 = vmatprep.subr.bf16.mxu0 %v773_v37  ;;  %567 = vmatpush3.bf16.msra.mxu1 %v678_v41  ;;  %v547_v15 = vsel %vm980_vm4, 1.0, %v773_v37  ;;  %s548_s1 = sshll.u32 %s761_s3, 3  ;;  %s549_s16 = sshll.u32 %s969_s30, 3 }
  0xf0   : > { %568 = vmatprep.subr.bf16.mxu1 %v773_v37  ;;  %669 = vset.pattern.permute.xlu0 %v776_v59  ;;  %v670_v17 = vpack.i.bf16 %v547_v15, %v546_v14  ;;  %v419_v37 = vsel %vm980_vm4, 1, %v776_v59  ;;  %s432_s15 = scalar_lea.vmem %s1055_s7, %s548_s1  ;;  %s439_s18 = scalar_lea.vmem %s1055_s7, %s549_s16 }
  0xf1   : > { %v212_v46 = vld [vmem:[%s211_s10] sm:$0xff]  ;;  %v216_v48 = vld [vmem:[%s215_s11 + $0x8] sm:$0xff]  ;;  %675 = vset.pattern.permute.xlu1 %v776_v59  ;;  %s198_s3 = sadd.s32 1, %s761_s3  }
  0xf2   : > { %561 = vmatpush3.bf16.msra.mxu0 %v677_v40  ;;  %301 = vrot.lane.b32.xlu0 %v295_v42, %s775_s24  ;;  %v223_v47 = vadd.f32 %v889_v11, %v212_v46  ;;  %v294_v52 = vadd.f32 %v894_v12, %v216_v48  ;;  %p197_p1 = scmp.ge.s32.totalorder %s198_s3, %s1047_s0 }
  0xf3   : > { %569 = vmatpush3.bf16.msra.mxu1 %v679_v43 }
 0x160   : > { %v231_v44 = vpop.permute.xlu0 %230 }
 0x161   : > { %563 = vmatmul.mubr.msk.bf16.vlgmr.msra.gmra.mrb[0].mxu0 %vm82_vm0, %v231_v44 }
 0x164   : > { %v302_v45 = vpop.permute.xlu0 %301 }
 0x165   : > { %571 = vmatmul.mubr.msk.bf16.vlgmr.msra.gmra.mrb[0].mxu1 %vm82_vm0, %v302_v45 }
 0x234   : > { %v281_v49 = vpop.f32.mrb[0].mxu0 }
 0x235   : > { %v287_v50 = vadd.f32 %v281_v49, %v223_v47  ;;  %v564_v51 = vpop.f32.mrb[1].mxu0 }
 0x236   : > { %v284_v53 = vpop.f32.mrb[2].mxu0 }
 0x237   : > { %680 = vtanh.f32 %v287_v50  ;;  %v565_v54 = vpop.f32.mrb[3].mxu0  ;;  %v544_v63 = vmul.f32 -1.442695, %v287_v50 }
 0x238   : > { %v352_v55 = vpop.f32.mrb[0].mxu1 }
 0x239   : > { %v358_v56 = vadd.f32 %v352_v55, %v294_v52  ;;  %v572_v57 = vpop.f32.mrb[1].mxu1 }
 0x23a   : > { %v355_v58 = vpop.f32.mrb[2].mxu1 }
 0x23b   : > { %682 = vtanh.f32 %v358_v56  ;;  %v573_v60 = vpop.f32.mrb[3].mxu1  ;;  %v545_v2 = vmul.f32 -1.442695, %v358_v56 }
 0x23c   : > { %684 = vpow2.f32 %v544_v63 }
 0x23d   : > { %686 = vpow2.f32 %v545_v2 }
 0x241   : > { %v681_v61 = vpop.eup %680 }
 0x242   : > { %368 = vrot.lane.b32.xlu1 %v681_v61, %s777_s12 }
 0x245   : > { %v683_v62 = vpop.eup %682 }
 0x246   : > { %392 = vrot.lane.b32.xlu1 %v683_v62, %s777_s12  ;;  %v685_v3 = vpop.eup %684 }
 0x247   : > { %v362_v4 = vadd.f32 1.0, %v685_v3  ;;  %v687_v5 = vpop.eup %686 }
 0x248   : > { %v386_v6 = vadd.f32 1.0, %v687_v5 }
 0x249   : > { %688 = vrcp.f32 %v362_v4 }
 0x24a   : > { %690 = vrcp.f32 %v386_v6 }
 0x253   : > { %v689_v10 = vpop.eup %688 }
 0x254   : > { %v691_v18 = vpop.eup %690  ;;  %v366_v22 = vmul.f32 %v753_v35, %v689_v10 }
 0x255   : > { %v390_v25 = vmul.f32 %v745_v33, %v691_v18 }
 0x2b4   : > { %v369_v13 = vpop.permute.xlu1 %368 }
 0x2b5   : > { %v371_v16 = vmul.f32 %v689_v10, %v369_v13 }
 0x2b7   : > { %373 = vrot.lane.b32.xlu0 %v371_v16, %s775_s24 }
 0x2b8   : > { %v393_v19 = vpop.permute.xlu1 %392 }
 0x2b9   : > { %v395_v20 = vmul.f32 %v691_v18, %v393_v19 }
 0x2bb   : > { %671 = vperm.xlu0 %669, %v670_v17   ;;  %397 = vrot.lane.b32.xlu1 %v395_v20, %s775_s24 }
 0x2bf   : > { %445 = vperm.xlu0 %669, %v411_v21  }
 0x329   : > { %v374_v23 = vpop.permute.xlu0 %373 }
 0x32a   : > { %v376_v24 = vadd.f32 %v374_v23, %v366_v22 }
 0x32c   : > { %692 = vtanh.f32 %v376_v24 }
 0x32d   : > { %v398_v26 = vpop.permute.xlu1 %397 }
 0x32e   : > { %v400_v27 = vadd.f32 %v398_v26, %v390_v25 }
 0x330   : > { %694 = vtanh.f32 %v400_v27 }
 0x336   : > { %v693_v28 = vpop.eup %692 }
 0x337   : > { %379 = vrot.lane.b32.xlu1 %v693_v28, %s777_s12 }
 0x33a   : > { %v695_v29 = vpop.eup %694  ;;  %v672_v30 = vpop.permute.xlu0 %671 }
 0x33b   : > { %403 = vrot.lane.b32.xlu1 %v695_v29, %s777_s12  ;;  %v673_v39 = vunpack.i.l.bf16 %v672_v30  ;;  %v674_v42 = vunpack.i.h.bf16 %v672_v30 }
 0x33e   : > { %v446_v38 = vpop.permute.xlu0 %445 }
 0x33f   : > { %vm447_vm5 = vcmp.eq.s32.totalorder %v446_v38, 1  ;;  %451 = vperm.xlu1 %675, %v419_v37  }
 0x340   : > { %v449_v35 = vsel %vm447_vm5, %v376_v24, %v753_v35  }
 0x3a9   : > { %v380_v40 = vpop.permute.xlu1 %379 }
 0x3aa   : > { %v382_v41 = vmul.f32 %v689_v10, %v380_v40 }
 0x3ac   : > { %v418_v43 = vmul.f32 %v673_v39, %v382_v41  ;;  %v448_v36 = vsel %vm447_vm5, %v382_v41, %v757_v36  }
 0x3ad   : > { %v404_v44 = vpop.permute.xlu1 %403 }
 0x3ae   : > { %v442_v45 = vadd.f32 %v741_v32, %v418_v43   ;;  %v406_v46 = vmul.f32 %v691_v18, %v404_v44  ;;  %428 = vrot.lane.b32.xlu0 %v418_v43, %s775_s24 }
 0x3b0   : > { %v426_v47 = vmul.f32 %v674_v42, %v406_v46  ;;  %v1061_v30 = vmov (%p197_p1), %v442_v45 }
 0x3b2   : > { %v443_v48 = vadd.f32 %v737_v31, %v426_v47   ;;  %435 = vrot.lane.b32.xlu1 %v426_v47, %s777_s12 }
 0x3b4   :  { %v1060_v29 = vmov (%p197_p1), %v443_v48 }
 0x3be   : > { %v452_v49 = vpop.permute.xlu1 %451 }
 0x3bf   : > { %vm453_vm6 = vcmp.eq.s32.totalorder %v452_v49, 1 }
 0x3c0   : > { %v454_v34 = vsel %vm453_vm6, %v406_v46, %v749_v34   ;;  %v455_v33 = vsel %vm453_vm6, %v400_v27, %v745_v33  }
 0x41f   :  { %200 = sbr.rel (!%p197_p1) target bundleno = 235 (0xeb), region = 63 }
 0x420   : > { %v429_v32 = vpop.permute.xlu0 %428 }
 0x421   : > { %433 = vst.msk [vmem:[%s432_s15] sm:$0xff] %vm82_vm0, %v429_v32  ;;  %v1059_v32 = vmov %v442_v45 }
 0x424   : > { %v436_v31 = vpop.permute.xlu1 %435 }
 0x425   : > { %441 = vst.msk [vmem:[%s439_s18] sm:$0xff] %vm440_vm7, %v436_v31  ;;  %v1058_v31 = vmov %v443_v48 }
 0x426 PF:  { %696 = vset.pattern.permute.xlu0 %v771_v1  ;;  %vm456_vm8 = vcmp.gt.s32.totalorder %v828_v0, 1  ;;  %s778_s0 = smov 64   ;;  %s779_s4 = smov 32   ;;  %vm477_vm9 = vcmask 523520   ;;  %v769_v30 = vphi %v901_v30, %v1061_v30   ;;  %v765_v29 = vphi %v899_v29, %v1060_v29  }
 0x427   :  { %v457_v50 = vsel %vm456_vm8, %v828_v0, 1 }
 0x428   :  { %v458_v36 = vcvt.s32.f32 %v457_v50 }
 0x42a   :  { %697 = vrcp.f32 %v458_v36 }
 0x434   :  { %v698_v51 = vpop.eup %697 }
 0x435   :  { %463 = vperm.xlu0 %696, %v698_v51  }
 0x4b4   :  { %v464_v11 = vpop.permute.xlu0 %463 }
 0x4b5   :  { %v466_v12 = vmul.f32 %v769_v30, %v464_v11  ;;  %v472_v33 = vmul.f32 %v765_v29, %v464_v11 }
 0x4b7   :  { %474 = vrot.lane.b32.xlu1 %v472_v33, %s778_s0  ;;  %468 = vrot.lane.b32.xlu0 %v466_v12, %s779_s4 }
 0x529   :  { %v475_v34 = vpop.permute.xlu1 %474  ;;  %v469_v35 = vpop.permute.xlu0 %468 }
 0x52a   :  { %471 = vst.msk [vmem:[%s1052_s8] sm:$0xff] %vm82_vm0, %v469_v35 }
 0x52b   :  { %478 = vst.msk [vmem:[%s1052_s8] sm:$0xff] %vm477_vm9, %v475_v34 }

</bundles_post_ra>
